<compile_context>
chip_gen: v7x
topology: tpu7x:2x2x1
jax: 0.10.0
libtpu: 0.0.40
codegen_flags: <defaults>
</compile_context>

<pallas_src>
import jax
import jax.numpy as jnp
from jax.experimental import pallas as pl
from jax.experimental.pallas import tpu as pltpu

# Small synthetic shapes consistent with the forward pass.
B, S, D = 2, 8, 32          # batch, seq, hidden
H = 4                       # attention heads
HD = D // H                 # head dim
F = 4 * D                   # MLP hidden
N_LAYERS = 2
EPS = 1e-5


def _fused_layers_kernel(x_ref, mask_ref, vecd_ref, b1_ref,
                         wqkv_ref, wo_ref, w1_ref, w2_ref,
                         o_ref, acc_ref):
    """One GPT-2-style block per (tile, layer) grid step.  The hidden state of
    the current token tile stays resident in the VMEM scratch `acc_ref`
    across all layers."""
    layer = pl.program_id(1)

    # ---- first layer of this tile: load activations into the f32 accumulator
    @pl.when(layer == 0)
    def _():
        acc_ref[...] = x_ref[0].astype(jnp.float32)

    x = acc_ref[...]                                        # [S, D], f32

    # Packed per-layer vectors:
    # rows = ln1_g, ln1_b, ln2_g, ln2_b, bq, bk, bv, bo, b2.
    vecs = vecd_ref[0]                                      # [9, D] f32
    ln1_g = vecs[0:1, :]
    ln1_b = vecs[1:2, :]
    ln2_g = vecs[2:3, :]
    ln2_b = vecs[3:4, :]
    bq = vecs[4:5, :]
    bk = vecs[5:6, :]
    bv = vecs[6:7, :]
    bo = vecs[7:8, :]
    b2 = vecs[8:9, :]
    b1 = b1_ref[0]                                          # [1, F] f32
    wq = wqkv_ref[0, 0]                                     # [D, D] bf16
    wk = wqkv_ref[0, 1]                                     # [D, D] bf16
    wv = wqkv_ref[0, 2]                                     # [D, D] bf16
    wo = wo_ref[0]                                          # [D, D] bf16
    w1 = w1_ref[0]                                          # [D, F] bf16
    w2 = w2_ref[0]                                          # [F, D] bf16

    # ---- LayerNorm 1 (f32) ----
    mu = jnp.mean(x, axis=-1, keepdims=True)
    var = jnp.mean((x - mu) ** 2, axis=-1, keepdims=True)
    h = (x - mu) * jax.lax.rsqrt(var + EPS) * ln1_g + ln1_b  # [S, D] f32
    h_lo = h.astype(jnp.bfloat16)

    # ---- Causal multi-head self-attention ----
    # Three lane-dense projections (no lane-offset slicing of a [S,3D] slab).
    scale = 1.0 / (HD ** 0.5)
    q = jnp.dot(h_lo, wq, preferred_element_type=jnp.float32) + bq   # [S, D]
    k = jnp.dot(h_lo, wk, preferred_element_type=jnp.float32) + bk
    v = jnp.dot(h_lo, wv, preferred_element_type=jnp.float32) + bv
    q = q * scale                                            # pre-scaled q

    # Head-major layout; heads become the batch dim of the einsums.
    qh = jnp.transpose(q.reshape(S, H, HD), (1, 0, 2)).astype(jnp.bfloat16)
    kh = jnp.transpose(k.reshape(S, H, HD), (1, 0, 2)).astype(jnp.bfloat16)
    vh = jnp.transpose(v.reshape(S, H, HD), (1, 0, 2)).astype(jnp.bfloat16)

    s = jnp.einsum('hqd,hkd->hqk', qh, kh,
                   preferred_element_type=jnp.float32)       # [H, S, S] f32
    s = s + mask_ref[...]                                    # [1,S,S] bcast (f32)
    m = jnp.max(s, axis=-1, keepdims=True)
    p = jnp.exp(s - m)
    denom = jnp.sum(p, axis=-1, keepdims=True)
    p = (p * pl.reciprocal(denom, approx=True)).astype(jnp.bfloat16)
    ctx = jnp.einsum('hqk,hkd->hqd', p, vh,
                     preferred_element_type=jnp.float32)     # [H, S, HD] f32
    ctx = jnp.transpose(ctx, (1, 0, 2)).reshape(S, D).astype(jnp.bfloat16)
    attn = jnp.dot(ctx, wo, preferred_element_type=jnp.float32)       # [S, D]
    x = x + attn + bo

    # ---- LayerNorm 2 + MLP ----
    mu2 = jnp.mean(x, axis=-1, keepdims=True)
    var2 = jnp.mean((x - mu2) ** 2, axis=-1, keepdims=True)
    h2 = (x - mu2) * jax.lax.rsqrt(var2 + EPS) * ln2_g + ln2_b
    m1 = jnp.dot(h2.astype(jnp.bfloat16), w1,
                 preferred_element_type=jnp.float32) + b1              # [S, F]
    m1 = jax.nn.gelu(m1, approximate=True)                   # GPT-2 "gelu_new"
    m2 = jnp.dot(m1.astype(jnp.bfloat16), w2,
                 preferred_element_type=jnp.float32)                   # [S, D]
    x = x + m2 + b2

    acc_ref[...] = x

    # ---- last layer of this tile: single HBM writeback ----
    @pl.when(layer == pl.num_programs(1) - 1)
    def _():
        o_ref[...] = x[None, :, :].astype(o_ref.dtype)


def _stack_layer_params(layer_params):
    """Stack per-layer parameters along a leading layer axis.

    * The six-plus-three D-sized vectors are packed into one [L, 9, D] f32
      array (fewer tiny DMA descriptors).
    * Wqkv is pre-split into [L, 3, D, D] so q/k/v are separate lane-dense
      matmuls in the kernel.
    * All matmul weights are stored in bf16 (halves weight DMA bytes, native
      MXU bf16 path).
    """
    def pack_vecs(p):
        bq, bk, bv = jnp.split(p["bqkv"], 3)
        return jnp.stack([p["ln1_g"], p["ln1_b"], p["ln2_g"], p["ln2_b"],
                          bq, bk, bv, p["bo"], p["b2"]], axis=0)      # [9, D]

    vec_d = jnp.stack([pack_vecs(p) for p in layer_params],
                      axis=0).astype(jnp.float32)                      # [L, 9, D]
    b1 = jnp.stack([p["b1"] for p in layer_params]
                   )[:, None, :].astype(jnp.float32)                   # [L, 1, F]
    wqkv = jnp.stack(
        [jnp.stack(jnp.split(p["wqkv"], 3, axis=1), axis=0)            # [3, D, D]
         for p in layer_params], axis=0).astype(jnp.bfloat16)          # [L, 3, D, D]
    wo = jnp.stack([p["wo"] for p in layer_params]).astype(jnp.bfloat16)   # [L, D, D]
    w1 = jnp.stack([p["w1"] for p in layer_params]).astype(jnp.bfloat16)   # [L, D, F]
    w2 = jnp.stack([p["w2"] for p in layer_params]).astype(jnp.bfloat16)   # [L, F, D]
    return vec_d, b1, wqkv, wo, w1, w2


def hf_block_sequence(x, layer_params):
    """Mirrors HFBlockSequence.forward (x = layer(x)[0] for each layer); all
    layers fused into a single pallas_call with a (token-tile, layer) grid."""
    n_layers = len(layer_params)
    vec_d, b1, wqkv, wo, w1, w2 = _stack_layer_params(layer_params)

    # Additive causal mask, built once (f32; scores/softmax stay in f32).
    row = jnp.arange(S, dtype=jnp.int32)[:, None]
    col = jnp.arange(S, dtype=jnp.int32)[None, :]
    mask = jnp.where(row >= col, 0.0, -1e30).astype(jnp.float32)[None]   # [1,S,S]

    out = pl.pallas_call(
        _fused_layers_kernel,
        out_shape=jax.ShapeDtypeStruct((B, S, D), x.dtype),
        grid=(B, n_layers),                                   # (token tiles, layers)
        in_specs=[
            pl.BlockSpec((1, S, D), lambda b, l: (b, 0, 0)),        # x (per-tile)
            pl.BlockSpec((1, S, S), lambda b, l: (0, 0, 0)),        # causal mask (resident)
            pl.BlockSpec((1, 9, D), lambda b, l: (l, 0, 0)),        # packed ln/bias vecs
            pl.BlockSpec((1, 1, F), lambda b, l: (l, 0, 0)),        # b1
            pl.BlockSpec((1, 3, D, D), lambda b, l: (l, 0, 0, 0)),  # Wq/Wk/Wv (bf16)
            pl.BlockSpec((1, D, D), lambda b, l: (l, 0, 0)),        # Wo (bf16)
            pl.BlockSpec((1, D, F), lambda b, l: (l, 0, 0)),        # W1 (bf16)
            pl.BlockSpec((1, F, D), lambda b, l: (l, 0, 0)),        # W2 (bf16)
        ],
        out_specs=pl.BlockSpec((1, S, D), lambda b, l: (b, 0, 0)),  # per-tile output
        scratch_shapes=[pltpu.VMEM((S, D), jnp.float32)],           # resident hidden state
        compiler_params=pltpu.CompilerParams(
            # token tiles are independent (usable by both v7x TensorCores);
            # layers are a sequential carried loop.
            dimension_semantics=("parallel", "arbitrary"),
            vmem_limit_bytes=32 * 1024 * 1024),
    )(x, mask, vec_d, b1, wqkv, wo, w1, w2)
    return out


def init_params(key, n_layers):
    params = []
    scale = 0.02
    for _ in range(n_layers):
        key, k0, k1, k2, k3 = jax.random.split(key, 5)
        params.append(dict(
            ln1_g=jnp.ones((D,), jnp.float32),
            ln1_b=jnp.zeros((D,), jnp.float32),
            wqkv=scale * jax.random.normal(k0, (D, 3 * D), jnp.float32),
            bqkv=jnp.zeros((3 * D,), jnp.float32),
            wo=scale * jax.random.normal(k1, (D, D), jnp.float32),
            bo=jnp.zeros((D,), jnp.float32),
            ln2_g=jnp.ones((D,), jnp.float32),
            ln2_b=jnp.zeros((D,), jnp.float32),
            w1=scale * jax.random.normal(k2, (D, F), jnp.float32),
            b1=jnp.zeros((F,), jnp.float32),
            w2=scale * jax.random.normal(k3, (F, D), jnp.float32),
            b2=jnp.zeros((D,), jnp.float32),
        ))
    return params


if __name__ == "__main__":
    key = jax.random.PRNGKey(0)
    kx, kp = jax.random.split(key)
    x = jax.random.normal(kx, (B, S, D), dtype=jnp.float32)
    layer_params = init_params(kp, N_LAYERS)

    out = hf_block_sequence(x, layer_params)
    jax.block_until_ready(out)
    assert out.shape == (B, S, D) and out.dtype == jnp.float32
    assert bool(jnp.all(jnp.isfinite(out)))
    print("KERNEL_OK")
</pallas_src>

<mosaic_0001>
module attributes {stable_mosaic.version = 11 : i64} {
  func.func @_fused_layers_kernel(%arg0: i32, %arg1: i32, %arg2: memref<1x8x32xf32, #tpu.memory_space<vmem>>, %arg3: memref<1x8x8xf32, #tpu.memory_space<vmem>>, %arg4: memref<1x9x32xf32, #tpu.memory_space<vmem>>, %arg5: memref<1x1x128xf32, #tpu.memory_space<vmem>>, %arg6: memref<1x3x32x32xbf16, #tpu.memory_space<vmem>>, %arg7: memref<1x32x32xbf16, #tpu.memory_space<vmem>>, %arg8: memref<1x32x128xbf16, #tpu.memory_space<vmem>>, %arg9: memref<1x128x32xbf16, #tpu.memory_space<vmem>>, %arg10: memref<1x8x32xf32, #tpu.memory_space<vmem>>, %arg11: memref<8x32xf32, #tpu.memory_space<vmem>>) attributes {dimension_semantics = [#tpu.dimension_semantics<parallel>, #tpu.dimension_semantics<arbitrary>], iteration_bounds = array<i64: 2, 2>, scalar_prefetch = 0 : i64, scratch_operands = 1 : i64, tpu.core_type = #tpu.core_type<tc>, window_params = [{transform_indices = @transform_0, window_bounds = array<i64: 1, 8, 32>}, {pipeline_mode = #tpu.pipeline_mode<synchronous>, transform_indices = @transform_1, window_bounds = array<i64: 1, 8, 8>}, {transform_indices = @transform_2, window_bounds = array<i64: 1, 9, 32>}, {transform_indices = @transform_3, window_bounds = array<i64: 1, 1, 128>}, {transform_indices = @transform_4, window_bounds = array<i64: 1, 3, 32, 32>}, {transform_indices = @transform_5, window_bounds = array<i64: 1, 32, 32>}, {transform_indices = @transform_6, window_bounds = array<i64: 1, 32, 128>}, {transform_indices = @transform_7, window_bounds = array<i64: 1, 128, 32>}, {transform_indices = @transform_8, window_bounds = array<i64: 1, 8, 32>}]} {
    %c0_i32 = arith.constant 0 : i32
    %0 = arith.cmpi eq, %arg1, %c0_i32 : i32
    %1 = arith.extui %0 : i1 to i32
    %c0_i32_0 = arith.constant 0 : i32
    %2 = arith.cmpi ne, %1, %c0_i32_0 : i32
    scf.if %2 {
      %c0_57 = arith.constant 0 : index
      %c0_58 = arith.constant 0 : index
      %c0_59 = arith.constant 0 : index
      %143 = vector.load %arg2[%c0_57, %c0_58, %c0_59] : memref<1x8x32xf32, #tpu.memory_space<vmem>>, vector<1x8x32xf32>
      %144 = vector.shape_cast %143 : vector<1x8x32xf32> to vector<8x32xf32>
      %c0_60 = arith.constant 0 : index
      %c0_61 = arith.constant 0 : index
      %145 = vector.load %arg11[%c0_60, %c0_61] : memref<8x32xf32, #tpu.memory_space<vmem>>, vector<8x32xf32>
      tpu.vector_store %arg11[%c0_60, %c0_61], %144 {strides = array<i32>} : memref<8x32xf32, #tpu.memory_space<vmem>>, vector<8x32xf32>,
    } else {
    }
    %c0 = arith.constant 0 : index
    %c0_1 = arith.constant 0 : index
    %3 = vector.load %arg11[%c0, %c0_1] : memref<8x32xf32, #tpu.memory_space<vmem>>, vector<8x32xf32>
    %c0_2 = arith.constant 0 : index
    %c0_3 = arith.constant 0 : index
    %c0_4 = arith.constant 0 : index
    %4 = vector.load %arg4[%c0_2, %c0_3, %c0_4] : memref<1x9x32xf32, #tpu.memory_space<vmem>>, vector<1x9x32xf32>
    %5 = vector.shape_cast %4 : vector<1x9x32xf32> to vector<9x32xf32>
    %6 = vector.extract_strided_slice %5 {offsets = [0, 0], sizes = [1, 32], strides = [1, 1]} : vector<9x32xf32> to vector<1x32xf32>
    %7 = vector.extract_strided_slice %5 {offsets = [1, 0], sizes = [1, 32], strides = [1, 1]} : vector<9x32xf32> to vector<1x32xf32>
    %8 = vector.extract_strided_slice %5 {offsets = [2, 0], sizes = [1, 32], strides = [1, 1]} : vector<9x32xf32> to vector<1x32xf32>
    %9 = vector.extract_strided_slice %5 {offsets = [3, 0], sizes = [1, 32], strides = [1, 1]} : vector<9x32xf32> to vector<1x32xf32>
    %10 = vector.extract_strided_slice %5 {offsets = [4, 0], sizes = [1, 32], strides = [1, 1]} : vector<9x32xf32> to vector<1x32xf32>
    %11 = vector.extract_strided_slice %5 {offsets = [5, 0], sizes = [1, 32], strides = [1, 1]} : vector<9x32xf32> to vector<1x32xf32>
    %12 = vector.extract_strided_slice %5 {offsets = [6, 0], sizes = [1, 32], strides = [1, 1]} : vector<9x32xf32> to vector<1x32xf32>
    %13 = vector.extract_strided_slice %5 {offsets = [7, 0], sizes = [1, 32], strides = [1, 1]} : vector<9x32xf32> to vector<1x32xf32>
    %14 = vector.extract_strided_slice %5 {offsets = [8, 0], sizes = [1, 32], strides = [1, 1]} : vector<9x32xf32> to vector<1x32xf32>
    %c0_5 = arith.constant 0 : index
    %c0_6 = arith.constant 0 : index
    %c0_7 = arith.constant 0 : index
    %15 = vector.load %arg5[%c0_5, %c0_6, %c0_7] : memref<1x1x128xf32, #tpu.memory_space<vmem>>, vector<1x1x128xf32>
    %16 = vector.shape_cast %15 : vector<1x1x128xf32> to vector<1x128xf32>
    %c0_8 = arith.constant 0 : index
    %c0_9 = arith.constant 0 : index
    %c0_10 = arith.constant 0 : index
    %c0_11 = arith.constant 0 : index
    %17 = vector.load %arg6[%c0_8, %c0_9, %c0_10, %c0_11] : memref<1x3x32x32xbf16, #tpu.memory_space<vmem>>, vector<1x1x32x32xbf16>
    %18 = vector.shape_cast %17 : vector<1x1x32x32xbf16> to vector<32x32xbf16>
    %c0_12 = arith.constant 0 : index
    %c1 = arith.constant 1 : index
    %c0_13 = arith.constant 0 : index
    %c0_14 = arith.constant 0 : index
    %19 = vector.load %arg6[%c0_12, %c1, %c0_13, %c0_14] : memref<1x3x32x32xbf16, #tpu.memory_space<vmem>>, vector<1x1x32x32xbf16>
    %20 = vector.shape_cast %19 : vector<1x1x32x32xbf16> to vector<32x32xbf16>
    %c0_15 = arith.constant 0 : index
    %c2 = arith.constant 2 : index
    %c0_16 = arith.constant 0 : index
    %c0_17 = arith.constant 0 : index
    %21 = vector.load %arg6[%c0_15, %c2, %c0_16, %c0_17] : memref<1x3x32x32xbf16, #tpu.memory_space<vmem>>, vector<1x1x32x32xbf16>
    %22 = vector.shape_cast %21 : vector<1x1x32x32xbf16> to vector<32x32xbf16>
    %c0_18 = arith.constant 0 : index
    %c0_19 = arith.constant 0 : index
    %c0_20 = arith.constant 0 : index
    %23 = vector.load %arg7[%c0_18, %c0_19, %c0_20] : memref<1x32x32xbf16, #tpu.memory_space<vmem>>, vector<1x32x32xbf16>
    %24 = vector.shape_cast %23 : vector<1x32x32xbf16> to vector<32x32xbf16>
    %c0_21 = arith.constant 0 : index
    %c0_22 = arith.constant 0 : index
    %c0_23 = arith.constant 0 : index
    %25 = vector.load %arg8[%c0_21, %c0_22, %c0_23] : memref<1x32x128xbf16, #tpu.memory_space<vmem>>, vector<1x32x128xbf16>
    %26 = vector.shape_cast %25 : vector<1x32x128xbf16> to vector<32x128xbf16>
    %c0_24 = arith.constant 0 : index
    %c0_25 = arith.constant 0 : index
    %c0_26 = arith.constant 0 : index
    %27 = vector.load %arg9[%c0_24, %c0_25, %c0_26] : memref<1x128x32xbf16, #tpu.memory_space<vmem>>, vector<1x128x32xbf16>
    %28 = vector.shape_cast %27 : vector<1x128x32xbf16> to vector<128x32xbf16>
    %cst = arith.constant dense<0.000000e+00> : vector<8xf32>
    %29 = vector.multi_reduction <add>, %3, %cst [1] : vector<8x32xf32> to vector<8xf32>
    %30 = vector.shape_cast %29 : vector<8xf32> to vector<8x1xf32>
    %cst_27 = arith.constant 3.200000e+01 : f32
    %31 = vector.broadcast %cst_27 : f32 to vector<8x1xf32>
    %32 = arith.divf %30, %31 : vector<8x1xf32>
    %33 = vector.broadcast %32 : vector<8x1xf32> to vector<8x32xf32>
    %34 = arith.subf %3, %33 : vector<8x32xf32>
    %35 = arith.mulf %34, %34 : vector<8x32xf32>
    %cst_28 = arith.constant dense<0.000000e+00> : vector<8xf32>
    %36 = vector.multi_reduction <add>, %35, %cst_28 [1] : vector<8x32xf32> to vector<8xf32>
    %37 = vector.shape_cast %36 : vector<8xf32> to vector<8x1xf32>
    %cst_29 = arith.constant 3.200000e+01 : f32
    %38 = vector.broadcast %cst_29 : f32 to vector<8x1xf32>
    %39 = arith.divf %37, %38 : vector<8x1xf32>
    %40 = vector.broadcast %32 : vector<8x1xf32> to vector<8x32xf32>
    %41 = arith.subf %3, %40 : vector<8x32xf32>
    %cst_30 = arith.constant 9.99999974E-6 : f32
    %42 = vector.broadcast %cst_30 : f32 to vector<8x1xf32>
    %43 = arith.addf %39, %42 : vector<8x1xf32>
    %44 = math.rsqrt %43 : vector<8x1xf32>
    %45 = vector.broadcast %44 : vector<8x1xf32> to vector<8x32xf32>
    %46 = arith.mulf %41, %45 : vector<8x32xf32>
    %47 = vector.broadcast %6 : vector<1x32xf32> to vector<8x32xf32>
    %48 = arith.mulf %46, %47 : vector<8x32xf32>
    %49 = vector.broadcast %7 : vector<1x32xf32> to vector<8x32xf32>
    %50 = arith.addf %48, %49 : vector<8x32xf32>
    %51 = arith.truncf %50 : vector<8x32xf32> to vector<8x32xbf16>
    %cst_31 = arith.constant dense<0.000000e+00> : vector<8x32xf32>
    %52 = tpu.matmul %51, %18, %cst_31 {dimension_numbers = #tpu.dot_dimension_numbers<[1], [0], [0], [1], [0, 0, 1, 1], [], []>} : vector<8x32xbf16>, vector<32x32xbf16>, vector<8x32xf32> -> vector<8x32xf32>
    %53 = vector.broadcast %10 : vector<1x32xf32> to vector<8x32xf32>
    %54 = arith.addf %52, %53 : vector<8x32xf32>
    %cst_32 = arith.constant dense<0.000000e+00> : vector<8x32xf32>
    %55 = tpu.matmul %51, %20, %cst_32 {dimension_numbers = #tpu.dot_dimension_numbers<[1], [0], [0], [1], [0, 0, 1, 1], [], []>} : vector<8x32xbf16>, vector<32x32xbf16>, vector<8x32xf32> -> vector<8x32xf32>
    %56 = vector.broadcast %11 : vector<1x32xf32> to vector<8x32xf32>
    %57 = arith.addf %55, %56 : vector<8x32xf32>
    %cst_33 = arith.constant dense<0.000000e+00> : vector<8x32xf32>
    %58 = tpu.matmul %51, %22, %cst_33 {dimension_numbers = #tpu.dot_dimension_numbers<[1], [0], [0], [1], [0, 0, 1, 1], [], []>} : vector<8x32xbf16>, vector<32x32xbf16>, vector<8x32xf32> -> vector<8x32xf32>
    %59 = vector.broadcast %12 : vector<1x32xf32> to vector<8x32xf32>
    %60 = arith.addf %58, %59 : vector<8x32xf32>
    %cst_34 = arith.constant 0.353553385 : f32
    %61 = vector.broadcast %cst_34 : f32 to vector<8x32xf32>
    %62 = arith.mulf %54, %61 : vector<8x32xf32>
    %63 = vector.shape_cast %62 : vector<8x32xf32> to vector<8x4x8xf32>
    %64 = tpu.transpose %63, [1, 0, 2] : vector<8x4x8xf32> -> vector<4x8x8xf32>
    %65 = arith.truncf %64 : vector<4x8x8xf32> to vector<4x8x8xbf16>
    %66 = vector.shape_cast %57 : vector<8x32xf32> to vector<8x4x8xf32>
    %67 = tpu.transpose %66, [1, 0, 2] : vector<8x4x8xf32> -> vector<4x8x8xf32>
    %68 = arith.truncf %67 : vector<4x8x8xf32> to vector<4x8x8xbf16>
    %69 = vector.shape_cast %60 : vector<8x32xf32> to vector<8x4x8xf32>
    %70 = tpu.transpose %69, [1, 0, 2] : vector<8x4x8xf32> -> vector<4x8x8xf32>
    %71 = arith.truncf %70 : vector<4x8x8xf32> to vector<4x8x8xbf16>
    "tpu.trace_start"() <{level = 10 : i32, message = "hqd,hkd->hqk"}> : () -> ()
    %cst_35 = arith.constant dense<0.000000e+00> : vector<4x8x8xf32>
    %72 = tpu.matmul %65, %68, %cst_35 {dimension_numbers = #tpu.dot_dimension_numbers<[2], [2], [1], [1], [0, 0, 0, 1, 1, 1], [0], [0]>} : vector<4x8x8xbf16>, vector<4x8x8xbf16>, vector<4x8x8xf32> -> vector<4x8x8xf32>
    "tpu.trace_stop"() : () -> ()
    %c0_36 = arith.constant 0 : index
    %c0_37 = arith.constant 0 : index
    %c0_38 = arith.constant 0 : index
    %73 = vector.load %arg3[%c0_36, %c0_37, %c0_38] : memref<1x8x8xf32, #tpu.memory_space<vmem>>, vector<1x8x8xf32>
    %74 = vector.broadcast %73 : vector<1x8x8xf32> to vector<4x8x8xf32>
    %75 = arith.addf %72, %74 : vector<4x8x8xf32>
    %cst_39 = arith.constant dense<0xFF800000> : vector<4x8xf32>
    %76 = vector.multi_reduction <maximumf>, %75, %cst_39 [2] : vector<4x8x8xf32> to vector<4x8xf32>
    %77 = vector.shape_cast %76 : vector<4x8xf32> to vector<4x8x1xf32>
    %78 = vector.broadcast %77 : vector<4x8x1xf32> to vector<4x8x8xf32>
    %79 = arith.subf %75, %78 : vector<4x8x8xf32>
    %80 = math.exp %79 : vector<4x8x8xf32>
    %cst_40 = arith.constant dense<0.000000e+00> : vector<4x8xf32>
    %81 = vector.multi_reduction <add>, %80, %cst_40 [2] : vector<4x8x8xf32> to vector<4x8xf32>
    %82 = vector.shape_cast %81 : vector<4x8xf32> to vector<4x8x1xf32>
    %83 = tpu.reciprocal %82 {approx = true} : vector<4x8x1xf32> -> vector<4x8x1xf32>
    %84 = vector.broadcast %83 : vector<4x8x1xf32> to vector<4x8x8xf32>
    %85 = arith.mulf %80, %84 : vector<4x8x8xf32>
    %86 = arith.truncf %85 : vector<4x8x8xf32> to vector<4x8x8xbf16>
    "tpu.trace_start"() <{level = 10 : i32, message = "hqk,hkd->hqd"}> : () -> ()
    %cst_41 = arith.constant dense<0.000000e+00> : vector<4x8x8xf32>
    %87 = tpu.matmul %86, %71, %cst_41 {dimension_numbers = #tpu.dot_dimension_numbers<[2], [1], [1], [2], [0, 0, 0, 1, 1, 2], [0], [0]>} : vector<4x8x8xbf16>, vector<4x8x8xbf16>, vector<4x8x8xf32> -> vector<4x8x8xf32>
    "tpu.trace_stop"() : () -> ()
    %88 = tpu.transpose %87, [1, 0, 2] : vector<4x8x8xf32> -> vector<8x4x8xf32>
    %89 = vector.shape_cast %88 : vector<8x4x8xf32> to vector<8x32xf32>
    %90 = arith.truncf %89 : vector<8x32xf32> to vector<8x32xbf16>
    %cst_42 = arith.constant dense<0.000000e+00> : vector<8x32xf32>
    %91 = tpu.matmul %90, %24, %cst_42 {dimension_numbers = #tpu.dot_dimension_numbers<[1], [0], [0], [1], [0, 0, 1, 1], [], []>} : vector<8x32xbf16>, vector<32x32xbf16>, vector<8x32xf32> -> vector<8x32xf32>
    %92 = arith.addf %3, %91 : vector<8x32xf32>
    %93 = vector.broadcast %13 : vector<1x32xf32> to vector<8x32xf32>
    %94 = arith.addf %92, %93 : vector<8x32xf32>
    %cst_43 = arith.constant dense<0.000000e+00> : vector<8xf32>
    %95 = vector.multi_reduction <add>, %94, %cst_43 [1] : vector<8x32xf32> to vector<8xf32>
    %96 = vector.shape_cast %95 : vector<8xf32> to vector<8x1xf32>
    %cst_44 = arith.constant 3.200000e+01 : f32
    %97 = vector.broadcast %cst_44 : f32 to vector<8x1xf32>
    %98 = arith.divf %96, %97 : vector<8x1xf32>
    %99 = vector.broadcast %98 : vector<8x1xf32> to vector<8x32xf32>
    %100 = arith.subf %94, %99 : vector<8x32xf32>
    %101 = arith.mulf %100, %100 : vector<8x32xf32>
    %cst_45 = arith.constant dense<0.000000e+00> : vector<8xf32>
    %102 = vector.multi_reduction <add>, %101, %cst_45 [1] : vector<8x32xf32> to vector<8xf32>
    %103 = vector.shape_cast %102 : vector<8xf32> to vector<8x1xf32>
    %cst_46 = arith.constant 3.200000e+01 : f32
    %104 = vector.broadcast %cst_46 : f32 to vector<8x1xf32>
    %105 = arith.divf %103, %104 : vector<8x1xf32>
    %106 = vector.broadcast %98 : vector<8x1xf32> to vector<8x32xf32>
    %107 = arith.subf %94, %106 : vector<8x32xf32>
    %cst_47 = arith.constant 9.99999974E-6 : f32
    %108 = vector.broadcast %cst_47 : f32 to vector<8x1xf32>
    %109 = arith.addf %105, %108 : vector<8x1xf32>
    %110 = math.rsqrt %109 : vector<8x1xf32>
    %111 = vector.broadcast %110 : vector<8x1xf32> to vector<8x32xf32>
    %112 = arith.mulf %107, %111 : vector<8x32xf32>
    %113 = vector.broadcast %8 : vector<1x32xf32> to vector<8x32xf32>
    %114 = arith.mulf %112, %113 : vector<8x32xf32>
    %115 = vector.broadcast %9 : vector<1x32xf32> to vector<8x32xf32>
    %116 = arith.addf %114, %115 : vector<8x32xf32>
    %117 = arith.truncf %116 : vector<8x32xf32> to vector<8x32xbf16>
    %cst_48 = arith.constant dense<0.000000e+00> : vector<8x128xf32>
    %118 = tpu.matmul %117, %26, %cst_48 {dimension_numbers = #tpu.dot_dimension_numbers<[1], [0], [0], [1], [0, 0, 1, 1], [], []>} : vector<8x32xbf16>, vector<32x128xbf16>, vector<8x128xf32> -> vector<8x128xf32>
    %119 = vector.broadcast %16 : vector<1x128xf32> to vector<8x128xf32>
    %120 = arith.addf %118, %119 : vector<8x128xf32>
    %121 = arith.mulf %120, %120 : vector<8x128xf32>
    %122 = arith.mulf %120, %121 : vector<8x128xf32>
    %cst_49 = arith.constant 4.471500e-02 : f32
    %123 = vector.broadcast %cst_49 : f32 to vector<8x128xf32>
    %124 = arith.mulf %123, %122 : vector<8x128xf32>
    %125 = arith.addf %120, %124 : vector<8x128xf32>
    %cst_50 = arith.constant 0.797884583 : f32
    %126 = vector.broadcast %cst_50 : f32 to vector<8x128xf32>
    %127 = arith.mulf %126, %125 : vector<8x128xf32>
    %128 = math.tanh %127 : vector<8x128xf32>
    %cst_51 = arith.constant 1.000000e+00 : f32
    %129 = vector.broadcast %cst_51 : f32 to vector<8x128xf32>
    %130 = arith.addf %129, %128 : vector<8x128xf32>
    %cst_52 = arith.constant 5.000000e-01 : f32
    %131 = vector.broadcast %cst_52 : f32 to vector<8x128xf32>
    %132 = arith.mulf %131, %130 : vector<8x128xf32>
    %133 = arith.mulf %120, %132 : vector<8x128xf32>
    %134 = arith.truncf %133 : vector<8x128xf32> to vector<8x128xbf16>
    %cst_53 = arith.constant dense<0.000000e+00> : vector<8x32xf32>
    %135 = tpu.matmul %134, %28, %cst_53 {dimension_numbers = #tpu.dot_dimension_numbers<[1], [0], [0], [1], [0, 0, 1, 1], [], []>} : vector<8x128xbf16>, vector<128x32xbf16>, vector<8x32xf32> -> vector<8x32xf32>
    %136 = arith.addf %94, %135 : vector<8x32xf32>
    %137 = vector.broadcast %14 : vector<1x32xf32> to vector<8x32xf32>
    %138 = arith.addf %136, %137 : vector<8x32xf32>
    %c0_54 = arith.constant 0 : index
    %c0_55 = arith.constant 0 : index
    %139 = vector.load %arg11[%c0_54, %c0_55] : memref<8x32xf32, #tpu.memory_space<vmem>>, vector<8x32xf32>
    tpu.vector_store %arg11[%c0_54, %c0_55], %138 {strides = array<i32>} : memref<8x32xf32, #tpu.memory_space<vmem>>, vector<8x32xf32>,
    %c1_i32 = arith.constant 1 : i32
    %140 = arith.cmpi eq, %arg1, %c1_i32 : i32
    %141 = arith.extui %140 : i1 to i32
    %c0_i32_56 = arith.constant 0 : i32
    %142 = arith.cmpi ne, %141, %c0_i32_56 : i32
    scf.if %142 {
      %143 = vector.shape_cast %138 : vector<8x32xf32> to vector<1x8x32xf32>
      %c0_57 = arith.constant 0 : index
      %c0_58 = arith.constant 0 : index
      %c0_59 = arith.constant 0 : index
      %144 = vector.load %arg10[%c0_57, %c0_58, %c0_59] : memref<1x8x32xf32, #tpu.memory_space<vmem>>, vector<1x8x32xf32>
      tpu.vector_store %arg10[%c0_57, %c0_58, %c0_59], %143 {strides = array<i32>} : memref<1x8x32xf32, #tpu.memory_space<vmem>>, vector<1x8x32xf32>,
    } else {
    }
    return
  }
  func.func @transform_0(%arg0: i32, %arg1: i32) -> (i32, i32, i32) {
    %c0_i32 = arith.constant 0 : i32
    %c0_i32_0 = arith.constant 0 : i32
    %c0_i32_1 = arith.constant 0 : i32
    return %arg0, %c0_i32, %c0_i32_0 : i32, i32, i32
  }
  func.func @transform_1(%arg0: i32, %arg1: i32) -> (i32, i32, i32) {
    %c0_i32 = arith.constant 0 : i32
    %c0_i32_0 = arith.constant 0 : i32
    %c0_i32_1 = arith.constant 0 : i32
    %c0_i32_2 = arith.constant 0 : i32
    return %c0_i32, %c0_i32_0, %c0_i32_1 : i32, i32, i32
  }
  func.func @transform_2(%arg0: i32, %arg1: i32) -> (i32, i32, i32) {
    %c0_i32 = arith.constant 0 : i32
    %c0_i32_0 = arith.constant 0 : i32
    %c0_i32_1 = arith.constant 0 : i32
    return %arg1, %c0_i32, %c0_i32_0 : i32, i32, i32
  }
  func.func @transform_3(%arg0: i32, %arg1: i32) -> (i32, i32, i32) {
    %c0_i32 = arith.constant 0 : i32
    %c0_i32_0 = arith.constant 0 : i32
    %c0_i32_1 = arith.constant 0 : i32
    return %arg1, %c0_i32, %c0_i32_0 : i32, i32, i32
  }
  func.func @transform_4(%arg0: i32, %arg1: i32) -> (i32, i32, i32, i32) {
    %c0_i32 = arith.constant 0 : i32
    %c0_i32_0 = arith.constant 0 : i32
    %c0_i32_1 = arith.constant 0 : i32
    %c0_i32_2 = arith.constant 0 : i32
    return %arg1, %c0_i32, %c0_i32_0, %c0_i32_1 : i32, i32, i32, i32
  }
  func.func @transform_5(%arg0: i32, %arg1: i32) -> (i32, i32, i32) {
    %c0_i32 = arith.constant 0 : i32
    %c0_i32_0 = arith.constant 0 : i32
    %c0_i32_1 = arith.constant 0 : i32
    return %arg1, %c0_i32, %c0_i32_0 : i32, i32, i32
  }
  func.func @transform_6(%arg0: i32, %arg1: i32) -> (i32, i32, i32) {
    %c0_i32 = arith.constant 0 : i32
    %c0_i32_0 = arith.constant 0 : i32
    %c0_i32_1 = arith.constant 0 : i32
    return %arg1, %c0_i32, %c0_i32_0 : i32, i32, i32
  }
  func.func @transform_7(%arg0: i32, %arg1: i32) -> (i32, i32, i32) {
    %c0_i32 = arith.constant 0 : i32
    %c0_i32_0 = arith.constant 0 : i32
    %c0_i32_1 = arith.constant 0 : i32
    return %arg1, %c0_i32, %c0_i32_0 : i32, i32, i32
  }
  func.func @transform_8(%arg0: i32, %arg1: i32) -> (i32, i32, i32) {
    %c0_i32 = arith.constant 0 : i32
    %c0_i32_0 = arith.constant 0 : i32
    %c0_i32_1 = arith.constant 0 : i32
    return %arg0, %c0_i32, %c0_i32_0 : i32, i32, i32
  }
}

</mosaic_0001>

<bundles_post_ra>
// kernel: tpu_custom_call.1
= control target key start
LH: loop header
LB: loop body
LE: loop exit
PB: predicated region body
PF: predicated region fallthrough
CT: control target
= control target key end

     0   :  { %s3025_s0 = inlined_call_operand.vmem [shape: f32[2,8,32], index: 0, kind: input, shape index: {}]   ;;  %s3026_s1 = inlined_call_operand.vmem [shape: f32[1,8,8], index: 1, kind: input, shape index: {}]   ;;  %s3027_s2 = inlined_call_operand.vmem [shape: f32[2,9,32], index: 2, kind: input, shape index: {}]   ;;  %s3028_s3 = inlined_call_operand.vmem [shape: f32[2,1,128], index: 3, kind: input, shape index: {}]   ;;  %s3029_s4 = inlined_call_operand.vmem [shape: bf16[2,3,32,32], index: 4, kind: input, shape index: {}]   ;;  %s3030_s5 = inlined_call_operand.vmem [shape: bf16[2,32,32], index: 5, kind: input, shape index: {}]   ;;  %s3031_s6 = inlined_call_operand.vmem [shape: bf16[2,32,128], index: 6, kind: input, shape index: {}]   ;;  %s3032_s7 = inlined_call_operand.vmem [shape: bf16[2,128,32], index: 7, kind: input, shape index: {}]   ;;  %s3033_s8 = inlined_call_operand.hbm [shape: f32[2,8,32], index: 8, kind: output, shape index: {}]  }
   0x1   :  { %3044 = sst [smem:[#allocation15_spill]] %s3025_s0 }
   0x2   :  { %3045 = sst [smem:[#allocation16_spill]] %s3033_s8 }
   0x3   :  { %13 = vsyncpa [#allocation4], 0 }
   0x4   :  { %15 = vsyncpa [#allocation4 + $0x1], 0  ;;  %s2604_s27 = smov 0   ;;  %s2606_s28 = smov 0  }
   0x5   :  { %s2608_s29 = smov 0   ;;  %s2610_s30 = smov 0  }
   0x6   :  { %s2612_s9 = smov 0   ;;  %s2614_s10 = smov 0  }
   0x7   :  { %s2616_s11 = smov 0   ;;  %s2618_s12 = smov 0  }
   0x8 LB: > { %3046 = sst [smem:[#allocation6_spill]] %s2518_s27  ;;  %s2107_s13 = sadd.s32 4294967295, %s2546_s12   ;;  %s2546_s12 = sphi %s2618_s12, %s21_s12   ;;  %s2542_s11 = sphi %s2616_s11, %s3069_s11   ;;  %s2538_s10 = sphi %s2614_s10, %s3068_s10   ;;  %s2534_s9 = sphi %s2612_s9, %s3067_s9   ;;  %s2530_s30 = sphi %s2610_s30, %s3066_s30   ;;  %s2526_s29 = sphi %s2608_s29, %s3065_s29   ;;  %s2522_s28 = sphi %s2606_s28, %s3071_s28   ;;  %s2518_s27 = sphi %s2604_s27, %s3070_s27  }
   0x9   : > { %3047 = sst [smem:[#allocation7_spill]] %s2526_s29  ;;  %s2108_s14 = sadd.s32 4294967294, %s2546_s12  }
   0xa   : > { %3048 = sst [smem:[#allocation8_spill]] %s2538_s10  ;;  %s30_s15 = sadd.s32 1, %s2538_s10 }
   0xb   : > { %3049 = sst [smem:[#allocation9_spill]] %s2542_s11  ;;  %p31_p0 = scmp.ge.s32.totalorder %s30_s15, 2 }
   0xc   : > { %3050 = sst [smem:[#allocation10_spill]] %s2546_s12  ;;  %s33_s16 = sadd.s32 1, %s2542_s11 }
   0xd   : > { %p253_p1 = scmp.ne.s32.totalorder %s2526_s29, %s2522_s28  ;;  %p254_p2 = scmp.eq.s32.totalorder %s2107_s13, 3 }
   0xe   : > { %s3073_s15 = smov (%p31_p0, %s30_s15), 0  ;;  %s3075_s16 = smov (!%p31_p0, %s33_s16), %s2542_s11 }
   0xf   : > { %3051 = sst [smem:[#allocation11_spill]] %s3073_s15  ;;  %p2653_p3 = por %p254_p2, %p253_p1 }
  0x10   : > { %p259_p4 = scmp.ne.s32.totalorder %s2522_s28, %s2518_s27  ;;  %p35_p5 = scmp.ge.s32.totalorder %s3075_s16, 2 }
  0x11   : > { %p260_p6 = scmp.eq.s32.totalorder %s2108_s14, 3  ;;  %p2111_p7 = scmp.ge.s32.totalorder %s2546_s12, 1 }
  0x12   : > { %p334_p8 = scmp.lt.s32.totalorder %s2546_s12, 5  ;;  %s3077_s16 = smov (%p35_p5, %s3075_s16), 0 }
  0x13   : > { %3053 = sst [smem:[#allocation12_spill]] %s3077_s16  ;;  %p2663_p9 = por %p260_p6, %p259_p4 }
  0x14   : > { %p335_p10 = pnand %p2111_p7, %p334_p8  ;;  %s240_s19 = ssub.s32 %s2542_s11, %s3077_s16 }
  0x15   : > { %s3054_s18 = scalar_select %p2663_p9, 1, 0 }
  0x16   : > { %s243_s20 = sadd.s32 1, %s2526_s29  ;;  %p241_p11 = scmp.eq.s32.totalorder %s240_s19, 0 }
  0x17   : > { %3055 = sst [smem:[#allocation13_spill]] %s3054_s18  ;;  %338 = sbr.rel (%p335_p10) target bundleno = 2684 (0xa7c), region = 52 }
  0x18   : > { %s2671_s21 = scalar_select %p241_p11, %s2526_s29, %s243_s20  }
  0x19   : > { %s3035_s22 = sand.u32 (!%p335_p10), 1, %s2522_s28   ;;  %p395_p12 = scmp.lt.s32.totalorder (!%p335_p10), %s2534_s9, 1 }
  0x1a   : > { %3056 = sst [smem:[#allocation14_spill]] %s2671_s21  ;;  %s2677_s23 = sshll.u32 (!%p335_p10), %s3035_s22, 3 }
  0x1b   : > { %p399_p13 = scmp.lt.s32.totalorder (!%p335_p10), %s2530_s30, 1  ;;  %s3057_s0 = sld [smem:[#allocation15_spill]] (!%p335_p10) }
  0x1c   : > { %s394_s21 = scalar_lea.vmem (!%p335_p10), [#allocation3], %s2677_s23  ;;  %p2123_p0 = scmp.ne.s32.totalorder (!%p335_p10), %s2530_s30, 0 }
  0x1e   : > { %s396_s24 = scalar_select %p395_p12, %s2534_s9, 1 }
  0x1f   : > { %s2682_s25 = scalar_select %p399_p13, %s2530_s30, 1 }
  0x20   : > { %s2113_s26 = sshll.u32 %s396_s24, 3  ;;  %431 = sbr.rel (%p2123_p0) target bundleno = 39 (0x27), region = 56  ;;  %vm433_vm0 = vcmask (!%p2123_p0), 261120  }
  0x21   : > { %s398_s19 = scalar_lea.vmem %s3057_s0, %s2113_s26  ;;  %s2178_s20 = sshll.u32 %s2682_s25, 4 }
  0x22   : > { %s2691_s22 = scalar_lea.vmem %s3027_s2, %s2178_s20  ;;  %s2330_s29 = smul.u32 48, %s2682_s25  ;;  %v432_v0 = vld [vmem:[%s398_s19] sm:$0xff] (!%p2123_p0) }
  0x23   : > { %s2701_s12 = scalar_lea.vmem %s3030_s5, %s2178_s20  ;;  %s2706_s26 = scalar_lea.vmem %s3031_s6, %s2178_s20  ;;  %434 = vst.msk [vmem:[#allocation2] sm:$0xff] (!%p2123_p0), %vm433_vm0, %v432_v0 }
  0x24   : > { %s2181_s13 = sshll.u32 %s2682_s25, 6  ;;  %s2712_s16 = scalar_lea.vmem %s3029_s4, %s2330_s29 }
  0x25   : > { %s2717_s11 = scalar_lea.vmem %s3032_s7, %s2181_s13 }
  0x27 PF: > { %vm477_vm1 = vcmask 261120   ;;  %v2412_v8 = vld [vmem:[%s2712_s16] sm:$0xff]   ;;  %v2548_v9 = vmov 0.0   ;;  %vm2549_vm2 = vmmov 0   ;;  %v2413_v10 = vld [vmem:[%s2712_s16 + $0x8] sm:$0xff]   ;;  %v492_v13 = vlaneseq  ;;  %v2414_v25 = vld [vmem:[%s2712_s16 + $0x10] sm:$0xff]   ;;  %s3058_s13 = scalar_lea.vmem %s3028_s3, %s2682_s25 }
  0x28   : > { %2222 = vmatprep.subr.bf16.mxu0 %v2548_v9  ;;  %2226 = vmatprep.mubr.msk.bf16.mxu0 %vm2549_vm2, %v2548_v9  ;;  %v2741_v17 = vld [vmem:[%s2691_s22] sm:$0xff]  ;;  %v2415_v27 = vld [vmem:[%s2712_s16 + $0x18] sm:$0xff]   ;;  %v2417_v29 = vld [vmem:[%s2712_s16 + $0x28] sm:$0xff]   ;;  %s2550_s0 = smov 104   ;;  %s2551_s8 = smov 120   ;;  %vm1126_vm3 = vcmask 64512  }
  0x29   : > { %2223 = vmatpush3.bf16.msra.mxu0 %v2412_v8  ;;  %2246 = vmatprep.subr.bf16.mxu1 %v2548_v9  ;;  %v2737_v15 = vshrl.u32 %v492_v13, 7  ;;  %v2416_v28 = vld [vmem:[%s2712_s16 + $0x20] sm:$0xff]   ;;  %s2552_s27 = smov 112   ;;  %v2553_v49 = vmov 1983009808   ;;  %vm1362_vm4 = vcmask 1043456  }
  0x2a   : > { %v2721_v1 = vld [vmem:[#allocation2] sm:$0xff]  ;;  %2224 = vmatprep.subr.bf16.mxu0 %v2548_v9  ;;  %2248 = vmatprep.mubr.msk.bf16.mxu1 %vm2549_vm2, %v2548_v9  ;;  %v688_v50 = vunpack.c.l.s4 %v2553_v49  ;;  %v2554_v51 = vmov 1934713408   ;;  %s2556_s19 = smov 8   ;;  %s2557_s20 = smov 24   ;;  %vm1693_vm5 = vcmask 130048  }
  0x2b   : > { %v478_v2 = vsel %vm477_vm1, %v2721_v1, 0.0  ;;  %v494_v16 = vsub.s32 0, %v2737_v15  ;;  %v499_v18 = vsub.s32 1, %v2737_v15  ;;  %v564_v32 = vsub.s32 5, %v2737_v15  ;;  %p2173_p1 = scmp.ne.s32.totalorder %s2530_s30, 1 }
  0x2c   : > { %479 = vadd.xlane.f32.xlu0 %v478_v2  ;;  %v505_v35 = vsub.s32 4, %v2737_v15  ;;  %v720_v52 = vunpack.c.l.s4 %v2554_v51  ;;  %v689_v53 = vunpack.c.0.s8 %v688_v50  ;;  %vm1695_vm6 = vcmask 195584  }
  0x2d   : > { %2225 = vmatpush3.bf16.msra.mxu0 %v2413_v10  ;;  %v495_v19 = vrot.slane %v2741_v17, %v494_v16  ;;  %v500_v22 = vrot.slane %v2741_v17, %v499_v18  ;;  %v565_v36 = vrot.slane %v2741_v17, %v564_v32 }
  0x2e   : > { %2230 = vmatprep.subr.bf16.mxu0 %v2548_v9  ;;  %v506_v38 = vrot.slane %v2741_v17, %v505_v35  ;;  %v721_v56 = vunpack.c.0.s8 %v720_v52  ;;  %v2776_v57 = vsub.s32 %v689_v53, %v2737_v15 }
  0x30   : > { %v2779_v63 = vsub.s32 %v721_v56, %v2737_v15 }
  0xb9   : > { %v480_v3 = vpop.xlane.xlu0 %479 }
  0xba   : > { %v482_v4 = vmul.f32 0.03125, %v480_v3 }
  0xbc   : > { %v483_v5 = vsub.f32 %v2721_v1, %v482_v4 }
  0xbe   : > { %v484_v6 = vmul.f32 %v483_v5, %v483_v5 }
  0xc0   : > { %v485_v7 = vsel %vm477_vm1, %v484_v6, 0.0 }
  0xc1   : > { %486 = vadd.xlane.f32.xlu0 %v485_v7 }
 0x14e   : > { %v487_v11 = vpop.xlane.xlu0 %486 }
 0x14f   : > { %v488_v12 = vmul.f32 0.03125, %v487_v11 }
 0x151   : > { %v489_v14 = vadd.f32 1e-05, %v488_v12 }
 0x153   : > { %2430 = vrsqrt.f32 %v489_v14 }
 0x15d   : > { %v2431_v20 = vpop.eup %2430 }
 0x15e   : > { %v491_v21 = vmul.f32 %v2431_v20, %v483_v5 }
 0x160   : > { %v496_v23 = vmul.f32 %v495_v19, %v491_v21 }
 0x162   : > { %v501_v24 = vadd.f32 %v500_v22, %v496_v23 }
 0x164   : > { %v502_v26 = vpack.c.bf16 %v501_v24, %v501_v24 }
 0x166   : > { %2227 = vmatmul.mubr.msk.bf16.vlgmr.msra.gmra.mrb[0].mxu0 %vm477_vm1, %v502_v26 }
 0x167   : > { %2231 = vmatpush3.bf16.msra.mxu0 %v2414_v25  ;;  %2234 = vmatprep.mubr.msk.bf16.mxu0 %vm2549_vm2, %v2548_v9 }
 0x168   : > { %2232 = vmatprep.subr.bf16.mxu0 %v2548_v9 }
 0x16b   : > { %2233 = vmatpush3.bf16.msra.mxu0 %v2415_v27 }
 0x16c   : > { %2238 = vmatprep.subr.bf16.mxu0 %v2548_v9 }
 0x16e   : > { %2235 = vmatmul.mubr.msk.bf16.vlgmr.msra.gmra.mrb[4].mxu0 %vm477_vm1, %v502_v26 }
 0x16f   : > { %2239 = vmatpush3.bf16.msra.mxu0 %v2416_v28  ;;  %2242 = vmatprep.mubr.msk.bf16.mxu0 %vm2549_vm2, %v2548_v9 }
 0x170   : > { %2240 = vmatprep.subr.bf16.mxu0 %v2548_v9 }
 0x173   : > { %2241 = vmatpush3.bf16.msra.mxu0 %v2417_v29 }
 0x174   : > { %2252 = vmatprep.subr.bf16.mxu0 %v2548_v9 }
 0x176   : > { %2243 = vmatmul.mubr.msk.bf16.vlgmr.msra.gmra.mrb[8].mxu0 %vm477_vm1, %v502_v26 }
 0x177   : > { %2254 = vmatprep.mubr.msk.bf16.mxu0 %vm2549_vm2, %v2548_v9 }
 0x239   : > { %v556_v30 = vpop.f32.mrb[0].mxu0 }
 0x23a   : > { %v2228_v31 = vpop.f32.mrb[1].mxu0  ;;  %v557_v43 = vadd.f32 %v556_v30, %v506_v38 }
 0x23b   : > { %v559_v33 = vpop.f32.mrb[2].mxu0 }
 0x23c   : > { %v2229_v34 = vpop.f32.mrb[3].mxu0  ;;  %v674_v45 = vmul.f32 0.35355338, %v557_v43 }
 0x241   : > { %v612_v37 = vpop.f32.mrb[4].mxu0 }
 0x242   : > { %v613_v39 = vadd.f32 %v612_v37, %v565_v36  ;;  %v2236_v40 = vpop.f32.mrb[5].mxu0 }
 0x243   : > { %v615_v41 = vpop.f32.mrb[6].mxu0 }
 0x244   : > { %832 = vrot.lane.b32.xlu0 %v613_v39, %s2550_s0  ;;  %826 = vrot.lane.b32.xlu1 %v613_v39, %s2551_s8  ;;  %v2237_v42 = vpop.f32.mrb[7].mxu0 }
 0x248   : > { %829 = vrot.lane.b32.xlu1 %v613_v39, %s2552_s27 }
 0x249   : > { %v2770_v44 = vpop.f32.mrb[8].mxu0 }
 0x24a   : > { %v2244_v46 = vpop.f32.mrb[9].mxu0 }
 0x24b   : > { %v671_v47 = vpop.f32.mrb[10].mxu0 }
 0x24c   : > { %676 = vrot.lane.b32.xlu1 %v674_v45, %s2551_s8  ;;  %v2245_v48 = vpop.f32.mrb[11].mxu0 }
 0x250   : > { %679 = vrot.lane.b32.xlu1 %v674_v45, %s2552_s27 }
 0x254   : > { %682 = vrot.lane.b32.xlu1 %v674_v45, %s2550_s0 }
 0x2b6   : > { %v833_v54 = vpop.permute.xlu0 %832  ;;  %v827_v55 = vpop.permute.xlu1 %826 }
 0x2b7   : > { %v851_v58 = vcombine.low %v827_v55, %v833_v54  ;;  %v852_v59 = vcombine.high %v827_v55, %v833_v54 }
 0x2b9   : > { %v859_v0 = vrot.slane %v851_v58, %v2776_v57  ;;  %v866_v2 = vrot.slane %v852_v59, %v2776_v57 }
 0x2ba   : > { %v830_v60 = vpop.permute.xlu1 %829 }
 0x2bb   : > { %v835_v61 = vcombine.low %v613_v39, %v830_v60  ;;  %v836_v62 = vcombine.high %v613_v39, %v830_v60 }
 0x2bd   : > { %v843_v3 = vrot.slane %v835_v61, %v2776_v57  ;;  %v850_v4 = vrot.slane %v836_v62, %v2776_v57 }
 0x2be   : > { %v677_v5 = vpop.permute.xlu1 %676 }
 0x2bf   : > { %v867_v6 = vcombine.low %v843_v3, %v859_v0  ;;  %v868_v7 = vcombine.high %v843_v3, %v859_v0  ;;  %v883_v8 = vcombine.low %v850_v4, %v866_v2  ;;  %v884_v10 = vcombine.high %v850_v4, %v866_v2 }
 0x2c1   : > { %v875_v11 = vrot.slane %v867_v6, %v2779_v63  ;;  %v882_v12 = vrot.slane %v868_v7, %v2779_v63  ;;  %v891_v13 = vrot.slane %v883_v8, %v2779_v63  ;;  %v898_v14 = vrot.slane %v884_v10, %v2779_v63 }
 0x2c2   : > { %v680_v16 = vpop.permute.xlu1 %679 }
 0x2c3   : > { %v903_v18 = vcombine.low %v875_v11, %v882_v12  ;;  %v2143_v19 = vcombine.high %v875_v11, %v882_v12  ;;  %v919_v20 = vcombine.low %v891_v13, %v898_v14  ;;  %v2144_v21 = vcombine.high %v891_v13, %v898_v14 }
 0x2c4   : > { %v685_v22 = vcombine.low %v674_v45, %v680_v16  ;;  %v686_v23 = vcombine.high %v674_v45, %v680_v16 }
 0x2c5   : > { %v910_v24 = vrot.slane %v903_v18, %v2776_v57  ;;  %v918_v25 = vrot.slane %v2143_v19, %v2776_v57  ;;  %v926_v26 = vrot.slane %v919_v20, %v2776_v57  ;;  %v934_v27 = vrot.slane %v2144_v21, %v2776_v57 }
 0x2c6   : > { %v683_v28 = vpop.permute.xlu1 %682  ;;  %v693_v33 = vrot.slane %v685_v22, %v2776_v57  ;;  %v700_v34 = vrot.slane %v686_v23, %v2776_v57 }
 0x2c7   : > { %v701_v29 = vcombine.low %v677_v5, %v683_v28  ;;  %v702_v30 = vcombine.high %v677_v5, %v683_v28  ;;  %v935_v31 = vcombine.low %v910_v24, %v918_v25  ;;  %v951_v32 = vcombine.low %v926_v26, %v934_v27 }
 0x2c8   : > { %v936_v39 = vcombine.high %v910_v24, %v918_v25  ;;  %v952_v40 = vcombine.high %v926_v26, %v934_v27 }
 0x2c9   : > { %v709_v35 = vrot.slane %v701_v29, %v2776_v57  ;;  %v716_v36 = vrot.slane %v702_v30, %v2776_v57  ;;  %v943_v37 = vrot.slane %v935_v31, %v2779_v63  ;;  %v959_v38 = vrot.slane %v951_v32, %v2779_v63  ;;  %v1125_v30 = vld [vmem:[%s3026_s1] sm:$0xff] }
 0x2ca   : > { %v950_v54 = vrot.slane %v936_v39, %v2779_v63  ;;  %v966_v55 = vrot.slane %v952_v40, %v2779_v63 }
 0x2cb   : > { %v717_v41 = vcombine.low %v693_v33, %v709_v35  ;;  %v718_v42 = vcombine.high %v693_v33, %v709_v35  ;;  %v733_v43 = vcombine.low %v700_v34, %v716_v36  ;;  %v734_v45 = vcombine.high %v700_v34, %v716_v36 }
 0x2cc   : > { %v967_v46 = vcombine.low %v943_v37, %v959_v38  ;;  %v968_v47 = vcombine.high %v943_v37, %v959_v38  ;;  %v969_v7 = vcombine.low %v950_v54, %v966_v55  ;;  %v970_v8 = vcombine.high %v950_v54, %v966_v55 }
 0x2cd   : > { %v725_v48 = vrot.slane %v717_v41, %v2779_v63  ;;  %v732_v49 = vrot.slane %v718_v42, %v2779_v63  ;;  %v741_v50 = vrot.slane %v733_v43, %v2779_v63  ;;  %v748_v51 = vrot.slane %v734_v45, %v2779_v63 }
 0x2ce   : > { %v971_v52 = vpack.c.bf16 %v967_v46, %v967_v46  ;;  %v972_v53 = vpack.c.bf16 %v968_v47, %v968_v47  ;;  %v973_v18 = vpack.c.bf16 %v969_v7, %v969_v7  ;;  %v974_v19 = vpack.c.bf16 %v970_v8, %v970_v8 }
 0x2cf   : > { %v753_v56 = vcombine.low %v725_v48, %v732_v49  ;;  %v2141_v58 = vcombine.high %v725_v48, %v732_v49  ;;  %v769_v59 = vcombine.low %v741_v50, %v748_v51  ;;  %v2142_v60 = vcombine.high %v741_v50, %v748_v51 }
 0x2d0   : > { %v1131_v61 = vsel %vm1126_vm3, %v971_v52, 0  ;;  %v1177_v62 = vsel %vm1126_vm3, %v972_v53, 0  ;;  %v1223_v24 = vsel %vm1126_vm3, %v973_v18, 0  ;;  %v1269_v25 = vsel %vm1126_vm3, %v974_v19, 0 }
 0x2d1   : > { %v760_v0 = vrot.slane %v753_v56, %v2776_v57  ;;  %v768_v2 = vrot.slane %v2141_v58, %v2776_v57  ;;  %v776_v3 = vrot.slane %v769_v59, %v2776_v57  ;;  %v784_v4 = vrot.slane %v2142_v60, %v2776_v57  ;;  %2247 = vmatpush3.bf16.xpose.msra.mxu1 %v1131_v61 }
 0x2d2   : > { %2253 = vmatpush3.bf16.xpose.msra.mxu0 %v1177_v62  ;;  %2258 = vmatprep.subr.bf16.mxu1 %v2548_v9  ;;  %v620_v56 = vsub.s32 6, %v2737_v15 }
 0x2d3   : > { %2264 = vmatprep.subr.bf16.mxu0 %v2548_v9  ;;  %v785_v5 = vcombine.low %v760_v0, %v768_v2  ;;  %v801_v6 = vcombine.low %v776_v3, %v784_v4  ;;  %v786_v10 = vcombine.high %v760_v0, %v768_v2  ;;  %v802_v11 = vcombine.high %v776_v3, %v784_v4 }
 0x2d4   : > { %v621_v58 = vrot.slane %v2741_v17, %v620_v56 }
 0x2d5   : > { %v793_v12 = vrot.slane %v785_v5, %v2779_v63  ;;  %v809_v13 = vrot.slane %v801_v6, %v2779_v63  ;;  %v800_v22 = vrot.slane %v786_v10, %v2779_v63  ;;  %v816_v23 = vrot.slane %v802_v11, %v2779_v63 }
 0x2d6   : > { %v669_v59 = vadd.f32 %v2770_v44, %v621_v58 }
 0x2d7   : > { %v817_v14 = vcombine.low %v793_v12, %v809_v13  ;;  %v818_v16 = vcombine.high %v793_v12, %v809_v13  ;;  %v819_v26 = vcombine.low %v800_v22, %v816_v23  ;;  %v820_v27 = vcombine.high %v800_v22, %v816_v23 }
 0x2d9   : > { %v821_v20 = vpack.c.bf16 %v817_v14, %v817_v14  ;;  %v822_v21 = vpack.c.bf16 %v818_v16, %v818_v16  ;;  %v823_v28 = vpack.c.bf16 %v819_v26, %v819_v26  ;;  %v824_v29 = vpack.c.bf16 %v820_v27, %v820_v27 }
 0x2db   : > { %2249 = vmatmul.mubr.msk.bf16.vlgmr.msra.gmra.mrb[0].mxu1 %vm1126_vm3, %v821_v20  ;;  %2255 = vmatmul.mubr.msk.bf16.vlgmr.msra.gmra.mrb[12].mxu0 %vm1126_vm3, %v822_v21 }
 0x2dc   : > { %2259 = vmatpush3.bf16.xpose.msra.mxu1 %v1223_v24  ;;  %2265 = vmatpush3.bf16.xpose.msra.mxu0 %v1269_v25 }
 0x2dd   : > { %2260 = vmatprep.mubr.msk.bf16.mxu1 %vm2549_vm2, %v2548_v9  ;;  %2266 = vmatprep.mubr.msk.bf16.mxu0 %vm2549_vm2, %v2548_v9 }
 0x2de   : > { %2270 = vmatprep.subr.bf16.mxu1 %v2548_v9  ;;  %2276 = vmatprep.subr.bf16.mxu0 %v2548_v9 }
 0x2e3   : > { %2261 = vmatmul.mubr.msk.bf16.vlgmr.msra.gmra.mrb[4].mxu1 %vm1126_vm3, %v823_v28  ;;  %2267 = vmatmul.mubr.msk.bf16.vlgmr.msra.gmra.mrb[16].mxu0 %vm1126_vm3, %v824_v29 }
 0x2e4   : > { %2272 = vmatprep.mubr.msk.bf16.mxu1 %vm2549_vm2, %v2548_v9  ;;  %2278 = vmatprep.mubr.msk.bf16.mxu0 %vm2549_vm2, %v2548_v9 }
 0x3ae   : > { %v1167_v31 = vpop.f32.mrb[0].mxu1  ;;  %v1213_v32 = vpop.f32.mrb[12].mxu0 }
 0x3af   : > { %v1168_v33 = vadd.f32 %v1167_v31, %v1125_v30  ;;  %v1214_v34 = vadd.f32 %v1213_v32, %v1125_v30  ;;  %v2250_v35 = vpop.f32.mrb[1].mxu1  ;;  %v2256_v36 = vpop.f32.mrb[13].mxu0 }
 0x3b0   : > { %v1170_v37 = vpop.f32.mrb[2].mxu1  ;;  %v1216_v38 = vpop.f32.mrb[14].mxu0 }
 0x3b1   : > { %v2251_v39 = vpop.f32.mrb[3].mxu1  ;;  %v2257_v40 = vpop.f32.mrb[15].mxu0  ;;  %v1311_v41 = vsel %vm1126_vm3, %v1168_v33, -inf  ;;  %v1314_v42 = vsel %vm1126_vm3, %v1214_v34, -inf }
 0x3b2   : > { %1312 = vmax.xlane.f32.xlu1 %v1311_v41  ;;  %1315 = vmax.xlane.f32.xlu0 %v1314_v42 }
 0x3b6   : > { %v1259_v43 = vpop.f32.mrb[4].mxu1  ;;  %v1305_v45 = vpop.f32.mrb[16].mxu0 }
 0x3b7   : > { %v1260_v46 = vadd.f32 %v1259_v43, %v1125_v30  ;;  %v2262_v47 = vpop.f32.mrb[5].mxu1  ;;  %v2268_v48 = vpop.f32.mrb[17].mxu0  ;;  %v1306_v51 = vadd.f32 %v1305_v45, %v1125_v30 }
 0x3b8   : > { %v1262_v49 = vpop.f32.mrb[6].mxu1  ;;  %v1308_v50 = vpop.f32.mrb[18].mxu0 }
 0x3b9   : > { %v2263_v52 = vpop.f32.mrb[7].mxu1  ;;  %v2269_v53 = vpop.f32.mrb[19].mxu0  ;;  %v1317_v54 = vsel %vm1126_vm3, %v1260_v46, -inf  ;;  %v1320_v55 = vsel %vm1126_vm3, %v1306_v51, -inf }
 0x3ba   : > { %1318 = vmax.xlane.f32.xlu1 %v1317_v54 }
 0x3be   : > { %1321 = vmax.xlane.f32.xlu1 %v1320_v55 }
 0x3cf   : > { %979 = vrot.lane.b32.xlu1 %v669_v59, %s2552_s27 }
 0x43f   : > { %v1313_v60 = vpop.xlane.xlu1 %1312  ;;  %v1316_v61 = vpop.xlane.xlu0 %1315 }
 0x440   : > { %v1323_v62 = vsub.f32 %v1168_v33, %v1313_v60  ;;  %v1324_v0 = vsub.f32 %v1214_v34, %v1316_v61 }
 0x442   : > { %v1327_v2 = vmul.f32 1.442695, %v1323_v62  ;;  %v1329_v3 = vmul.f32 1.442695, %v1324_v0 }
 0x444   : > { %2432 = vpow2.f32 %v1327_v2 }
 0x445   : > { %2434 = vpow2.f32 %v1329_v3 }
 0x447   : > { %v1319_v7 = vpop.xlane.xlu1 %1318 }
 0x448   : > { %v1325_v10 = vsub.f32 %v1260_v46, %v1319_v7 }
 0x44a   : > { %v1331_v12 = vmul.f32 1.442695, %v1325_v10 }
 0x44b   : > { %v1322_v8 = vpop.xlane.xlu1 %1321 }
 0x44c   : > { %v1326_v11 = vsub.f32 %v1306_v51, %v1322_v8  ;;  %2436 = vpow2.f32 %v1331_v12 }
 0x44e   : > { %v2844_v4 = vpop.eup %2432  ;;  %v1333_v13 = vmul.f32 1.442695, %v1326_v11 }
 0x44f   : > { %v2846_v5 = vpop.eup %2434  ;;  %v1335_v6 = vsel %vm1126_vm3, %v2844_v4, 0.0  ;;  %v980_v20 = vpop.permute.xlu1 %979 }
 0x450   : > { %1336 = vadd.xlane.f32.xlu0 %v1335_v6  ;;  %v1338_v44 = vsel %vm1126_vm3, %v2846_v5, 0.0  ;;  %2438 = vpow2.f32 %v1333_v13  ;;  %v985_v23 = vcombine.low %v669_v59, %v980_v20  ;;  %v986_v24 = vcombine.high %v669_v59, %v980_v20 }
 0x451   : > { %1339 = vadd.xlane.f32.xlu1 %v1338_v44 }
 0x452   : > { %v993_v29 = vrot.slane %v985_v23, %v2776_v57  ;;  %v1000_v30 = vrot.slane %v986_v24, %v2776_v57 }
 0x456   : > { %v2854_v14 = vpop.eup %2436 }
 0x457   : > { %v1341_v18 = vsel %vm1126_vm3, %v2854_v14, 0.0 }
 0x45a   : > { %v2856_v16 = vpop.eup %2438 }
 0x45b   : > { %v1344_v19 = vsel %vm1126_vm3, %v2856_v16, 0.0 }
 0x462   : > { %982 = vrot.lane.b32.xlu1 %v669_v59, %s2550_s0 }
 0x466   : > { %976 = vrot.lane.b32.xlu0 %v669_v59, %s2551_s8 }
 0x485   : > { %1342 = vadd.xlane.f32.xlu0 %v1341_v18 }
 0x486   : > { %1345 = vadd.xlane.f32.xlu1 %v1344_v19 }
 0x4dd   : > { %v1337_v21 = vpop.xlane.xlu0 %1336 }
 0x4de   : > { %v1340_v22 = vpop.xlane.xlu1 %1339  ;;  %2440 = vrcp.f32 %v1337_v21 }
 0x4df   : > { %2442 = vrcp.f32 %v1340_v22 }
 0x4e1   : > { %v977_v25 = vpop.permute.xlu0 %976 }
 0x4e2   : > { %v983_v26 = vpop.permute.xlu1 %982 }
 0x4e3   : > { %v1001_v27 = vcombine.low %v977_v25, %v983_v26  ;;  %v1002_v28 = vcombine.high %v977_v25, %v983_v26 }
 0x4e5   : > { %v1009_v31 = vrot.slane %v1001_v27, %v2776_v57  ;;  %v1016_v32 = vrot.slane %v1002_v28, %v2776_v57  ;;  %v2418_v27 = vld [vmem:[%s2701_s12] sm:$0xff]  }
 0x4e7   : > { %v1017_v33 = vcombine.low %v993_v29, %v1009_v31  ;;  %v1018_v34 = vcombine.high %v993_v29, %v1009_v31  ;;  %v1033_v35 = vcombine.low %v1000_v30, %v1016_v32  ;;  %v1034_v36 = vcombine.high %v1000_v30, %v1016_v32 }
 0x4e8   : > { %v2441_v56 = vpop.eup %2440 }
 0x4e9   : > { %v1025_v37 = vrot.slane %v1017_v33, %v2779_v63  ;;  %v1032_v38 = vrot.slane %v1018_v34, %v2779_v63  ;;  %v1041_v39 = vrot.slane %v1033_v35, %v2779_v63  ;;  %v1048_v40 = vrot.slane %v1034_v36, %v2779_v63  ;;  %v2443_v60 = vpop.eup %2442 }
 0x4ea   : > { %v1351_v3 = vmul.f32 %v2441_v56, %v2844_v4  ;;  %v1352_v6 = vmul.f32 %v2443_v60, %v2846_v5 }
 0x4eb   : > { %v1053_v41 = vcombine.low %v1025_v37, %v1032_v38  ;;  %v2145_v42 = vcombine.high %v1025_v37, %v1032_v38  ;;  %v1069_v43 = vcombine.low %v1041_v39, %v1048_v40  ;;  %v2146_v45 = vcombine.high %v1041_v39, %v1048_v40 }
 0x4ec   : > { %v1355_v13 = vpack.c.bf16 %v1351_v3, %v1351_v3  ;;  %v1356_v18 = vpack.c.bf16 %v1352_v6, %v1352_v6 }
 0x4ed   : > { %v1060_v46 = vrot.slane %v1053_v41, %v2776_v57  ;;  %v1068_v47 = vrot.slane %v2145_v42, %v2776_v57  ;;  %v1076_v48 = vrot.slane %v1069_v43, %v2776_v57  ;;  %v1084_v49 = vrot.slane %v2146_v45, %v2776_v57 }
 0x4ef   : > { %v1085_v50 = vcombine.low %v1060_v46, %v1068_v47  ;;  %v1086_v51 = vcombine.high %v1060_v46, %v1068_v47  ;;  %v1101_v52 = vcombine.low %v1076_v48, %v1084_v49  ;;  %v1102_v53 = vcombine.high %v1076_v48, %v1084_v49 }
 0x4f1   : > { %v1093_v54 = vrot.slane %v1085_v50, %v2779_v63  ;;  %v1100_v55 = vrot.slane %v1086_v51, %v2779_v63  ;;  %v1109_v58 = vrot.slane %v1101_v52, %v2779_v63  ;;  %v1116_v59 = vrot.slane %v1102_v53, %v2779_v63 }
 0x4f3   : > { %v1117_v61 = vcombine.low %v1093_v54, %v1109_v58  ;;  %v1118_v62 = vcombine.high %v1093_v54, %v1109_v58  ;;  %v1119_v0 = vcombine.low %v1100_v55, %v1116_v59  ;;  %v1120_v2 = vcombine.high %v1100_v55, %v1116_v59  ;;  %v2419_v55 = vld [vmem:[%s2701_s12 + $0x8] sm:$0xff]   ;;  %s2555_s12 = smov 16  }
 0x4f5   : > { %v1121_v44 = vpack.c.bf16 %v1117_v61, %v1117_v61  ;;  %v1122_v7 = vpack.c.bf16 %v1118_v62, %v1118_v62  ;;  %v1123_v11 = vpack.c.bf16 %v1119_v0, %v1119_v0  ;;  %v1124_v12 = vpack.c.bf16 %v1120_v2, %v1120_v2 }
 0x4f7   : > { %v1364_v8 = vsel %vm1362_vm4, %v1121_v44, 0  ;;  %v1410_v10 = vsel %vm1362_vm4, %v1122_v7, 0  ;;  %v1456_v4 = vsel %vm1362_vm4, %v1123_v11, 0  ;;  %v1502_v5 = vsel %vm1362_vm4, %v1124_v12, 0 }
 0x4f8   : > { %2271 = vmatpush3.bf16.msra.mxu1 %v1364_v8  ;;  %2277 = vmatpush3.bf16.msra.mxu0 %v1410_v10 }
 0x4f9   : > { %2282 = vmatprep.subr.bf16.mxu1 %v2548_v9  ;;  %2288 = vmatprep.subr.bf16.mxu0 %v2548_v9 }
 0x4fb   : > { %2273 = vmatmul.mubr.msk.bf16.vlgmr.msra.gmra.mrb[8].mxu1 %vm1126_vm3, %v1355_v13  ;;  %2279 = vmatmul.mubr.msk.bf16.vlgmr.msra.gmra.mrb[20].mxu0 %vm1126_vm3, %v1356_v18 }
 0x4fc   : > { %2283 = vmatpush3.bf16.msra.mxu1 %v1456_v4  ;;  %2289 = vmatpush3.bf16.msra.mxu0 %v1502_v5 }
 0x4fd   : > { %2284 = vmatprep.mubr.msk.bf16.mxu1 %vm2549_vm2, %v2548_v9  ;;  %2290 = vmatprep.mubr.msk.bf16.mxu0 %vm2549_vm2, %v2548_v9 }
 0x4fe   : > { %2294 = vmatprep.subr.bf16.mxu1 %v2548_v9  ;;  %2302 = vmatprep.subr.bf16.mxu0 %v2548_v9 }
 0x512   : > { %v1343_v19 = vpop.xlane.xlu0 %1342 }
 0x513   : > { %2444 = vrcp.f32 %v1343_v19  ;;  %v1346_v20 = vpop.xlane.xlu1 %1345 }
 0x514   : > { %2446 = vrcp.f32 %v1346_v20 }
 0x51d   : > { %v2445_v21 = vpop.eup %2444 }
 0x51e   : > { %v2447_v22 = vpop.eup %2446  ;;  %v1353_v23 = vmul.f32 %v2445_v21, %v2854_v14 }
 0x51f   : > { %v1354_v24 = vmul.f32 %v2447_v22, %v2856_v16 }
 0x520   : > { %v1357_v25 = vpack.c.bf16 %v1353_v23, %v1353_v23 }
 0x521   : > { %v1358_v26 = vpack.c.bf16 %v1354_v24, %v1354_v24 }
 0x522   : > { %2285 = vmatmul.mubr.msk.bf16.vlgmr.msra.gmra.mrb[12].mxu1 %vm1126_vm3, %v1357_v25 }
 0x523   : > { %2291 = vmatmul.mubr.msk.bf16.vlgmr.msra.gmra.mrb[24].mxu0 %vm1126_vm3, %v1358_v26  ;;  %2298 = vmatprep.mubr.msk.bf16.mxu1 %vm2549_vm2, %v2548_v9 }
 0x524   : > { %2306 = vmatprep.mubr.msk.bf16.mxu0 %vm2549_vm2, %v2548_v9  ;;  %2295 = vmatpush3.bf16.msra.mxu1 %v2418_v27 }
 0x525   : > { %2296 = vmatprep.subr.bf16.mxu1 %v2548_v9 }
 0x528   : > { %2297 = vmatpush3.bf16.msra.mxu1 %v2419_v55  ;;  %v2424_v55 = vld [vmem:[%s2717_s11 + $0x10] sm:$0xff]  }
 0x529   : > { %2310 = vmatprep.subr.bf16.mxu1 %v2548_v9 }
 0x5ce   : > { %v1400_v28 = vpop.f32.mrb[8].mxu1  ;;  %v1446_v14 = vpop.f32.mrb[20].mxu0 }
 0x5cf   : > { %v2274_v29 = vpop.f32.mrb[9].mxu1  ;;  %v2280_v16 = vpop.f32.mrb[21].mxu0 }
 0x5d0   : > { %v1403_v30 = vpop.f32.mrb[10].mxu1  ;;  %v1449_v31 = vpop.f32.mrb[22].mxu0 }
 0x5d1   : > { %v2275_v32 = vpop.f32.mrb[11].mxu1  ;;  %v2281_v33 = vpop.f32.mrb[23].mxu0 }
 0x5f5   : > { %v1492_v34 = vpop.f32.mrb[12].mxu1 }
 0x5f6   : > { %v1544_v35 = vcombine.low %v1400_v28, %v1492_v34  ;;  %v1545_v36 = vcombine.high %v1400_v28, %v1492_v34  ;;  %v1538_v37 = vpop.f32.mrb[24].mxu0  ;;  %v2286_v38 = vpop.f32.mrb[13].mxu1  ;;  %v1756_v28 = vsub.s32 7, %v2737_v15 }
 0x5f7   : > { %v1560_v39 = vcombine.low %v1446_v14, %v1538_v37  ;;  %v1561_v40 = vcombine.high %v1446_v14, %v1538_v37  ;;  %v2292_v41 = vpop.f32.mrb[25].mxu0  ;;  %v1495_v42 = vpop.f32.mrb[14].mxu1 }
 0x5f8   : > { %v1552_v43 = vrot.slane %v1544_v35, %v2776_v57  ;;  %v1559_v45 = vrot.slane %v1545_v36, %v2776_v57  ;;  %v1541_v46 = vpop.f32.mrb[26].mxu0  ;;  %v2287_v47 = vpop.f32.mrb[15].mxu1  ;;  %v1757_v14 = vrot.slane %v2741_v17, %v1756_v28 }
 0x5f9   : > { %v1568_v48 = vrot.slane %v1560_v39, %v2776_v57  ;;  %v1575_v49 = vrot.slane %v1561_v40, %v2776_v57  ;;  %v2293_v50 = vpop.f32.mrb[27].mxu0  ;;  %v2420_v40 = vld [vmem:[%s2706_s26] sm:$0xff]   ;;  %v1779_v46 = vsub.s32 3, %v2737_v15 }
 0x5fa   : > { %2303 = vmatpush3.bf16.msra.mxu0 %v2420_v40 }
 0x5fb   : > { %v1576_v51 = vcombine.low %v1552_v43, %v1568_v48  ;;  %v1577_v52 = vcombine.high %v1552_v43, %v1568_v48  ;;  %v1592_v53 = vcombine.low %v1559_v45, %v1575_v49  ;;  %v1593_v54 = vcombine.high %v1559_v45, %v1575_v49  ;;  %2304 = vmatprep.subr.bf16.mxu0 %v2548_v9 }
 0x5fc   : > { %v1774_v45 = vsub.s32 2, %v2737_v15  ;;  %v1780_v50 = vrot.slane %v2741_v17, %v1779_v46  ;;  %v2423_v15 = vld [vmem:[%s2717_s11 + $0x8] sm:$0xff]  }
 0x5fd   : > { %v1584_v56 = vrot.slane %v1576_v51, %v2779_v63  ;;  %v1591_v58 = vrot.slane %v1577_v52, %v2779_v63  ;;  %v1600_v59 = vrot.slane %v1592_v53, %v2779_v63  ;;  %v1607_v60 = vrot.slane %v1593_v54, %v2779_v63  ;;  %v2422_v54 = vld [vmem:[%s2717_s11] sm:$0xff]  }
 0x5fe   : > { %v1775_v47 = vrot.slane %v2741_v17, %v1774_v45  ;;  %v2425_v17 = vld [vmem:[%s2717_s11 + $0x18] sm:$0xff]  }
 0x5ff   : > { %v1612_v61 = vcombine.low %v1584_v56, %v1591_v58  ;;  %v2155_v62 = vcombine.high %v1584_v56, %v1591_v58  ;;  %v1628_v0 = vcombine.low %v1600_v59, %v1607_v60  ;;  %v2156_v2 = vcombine.high %v1600_v59, %v1607_v60  ;;  %v2426_v56 = vld [vmem:[%s2717_s11 + $0x20] sm:$0xff]   ;;  %v2427_v58 = vld [vmem:[%s2717_s11 + $0x28] sm:$0xff]   ;;  %v2428_v59 = vld [vmem:[%s2717_s11 + $0x30] sm:$0xff]  }
 0x600   : > { %v2429_v60 = vld [vmem:[%s2717_s11 + $0x38] sm:$0xff]  }
 0x601   : > { %v1619_v3 = vrot.slane %v1612_v61, %v2776_v57  ;;  %v1627_v6 = vrot.slane %v2155_v62, %v2776_v57  ;;  %v1635_v44 = vrot.slane %v1628_v0, %v2776_v57  ;;  %v1643_v7 = vrot.slane %v2156_v2, %v2776_v57  ;;  %v2160_v61 = vld [vmem:[%s3058_s13] ss:$0 sm:$0xff] }
 0x603   : > { %v1645_v8 = vcombine.high %v1619_v3, %v1627_v6  ;;  %v1661_v10 = vcombine.high %v1635_v44, %v1643_v7  ;;  %v1644_v11 = vcombine.low %v1619_v3, %v1627_v6  ;;  %v1660_v12 = vcombine.low %v1635_v44, %v1643_v7 }
 0x605   : > { %v1659_v13 = vrot.slane %v1645_v8, %v2779_v63  ;;  %v1675_v18 = vrot.slane %v1661_v10, %v2779_v63  ;;  %v1652_v4 = vrot.slane %v1644_v11, %v2779_v63  ;;  %v1668_v5 = vrot.slane %v1660_v12, %v2779_v63 }
 0x607   : > { %v1678_v19 = vcombine.low %v1659_v13, %v1675_v18  ;;  %v1677_v20 = vcombine.high %v1652_v4, %v1668_v5  ;;  %v1679_v21 = vcombine.high %v1659_v13, %v1675_v18  ;;  %v1676_v22 = vcombine.low %v1652_v4, %v1668_v5  ;;  %v2172_v5 = vld [vmem:[%s2691_s22 + $0x8] ss:$0 sm:$0xff] }
 0x609   : > { %1685 = vrot.lane.b32.xlu1 %v1678_v19, %s2555_s12  ;;  %1681 = vrot.lane.b32.xlu0 %v1677_v20, %s2556_s19 }
 0x60d   : > { %1689 = vrot.lane.b32.xlu0 %v1679_v21, %s2557_s20 }
 0x67b   : > { %v1682_v57 = vpop.permute.xlu0 %1681  ;;  %v1686_v23 = vpop.permute.xlu1 %1685 }
 0x67c   : > { %v1692_v24 = vsel %vm1126_vm3, %v1676_v22, %v1682_v57 }
 0x67d   : > { %v1694_v26 = vsel %vm1693_vm5, %v1692_v24, %v1686_v23 }
 0x67f   : > { %v1690_v25 = vpop.permute.xlu0 %1689 }
 0x680   : > { %v1696_v27 = vsel %vm1695_vm6, %v1694_v26, %v1690_v25 }
 0x681   : > { %v1697_v63 = vpack.c.bf16 %v1696_v27, %v1696_v27 }
 0x683   : > { %2299 = vmatmul.mubr.msk.bf16.vlgmr.msra.gmra.mrb[16].mxu1 %vm477_vm1, %v1697_v63 }
 0x684   : > { %2326 = vmatprep.mubr.msk.bf16.mxu1 %vm2549_vm2, %v2548_v9  ;;  %2311 = vmatpush3.bf16.msra.mxu1 %v2422_v54 }
 0x685   : > { %2312 = vmatprep.subr.bf16.mxu1 %v2548_v9 }
 0x688   : > { %2313 = vmatpush3.bf16.msra.mxu1 %v2423_v15 }
 0x689   : > { %2314 = vmatprep.subr.bf16.mxu1 %v2548_v9 }
 0x68c   : > { %2315 = vmatpush3.bf16.msra.mxu1 %v2424_v55 }
 0x68d   : > { %2316 = vmatprep.subr.bf16.mxu1 %v2548_v9 }
 0x690   : > { %2317 = vmatpush3.bf16.msra.mxu1 %v2425_v17 }
 0x691   : > { %2318 = vmatprep.subr.bf16.mxu1 %v2548_v9 }
 0x694   : > { %2319 = vmatpush3.bf16.msra.mxu1 %v2426_v56 }
 0x695   : > { %2320 = vmatprep.subr.bf16.mxu1 %v2548_v9 }
 0x698   : > { %2321 = vmatpush3.bf16.msra.mxu1 %v2427_v58 }
 0x699   : > { %2322 = vmatprep.subr.bf16.mxu1 %v2548_v9 }
 0x69c   : > { %2323 = vmatpush3.bf16.msra.mxu1 %v2428_v59 }
 0x69d   : > { %2324 = vmatprep.subr.bf16.mxu1 %v2548_v9 }
 0x6a0   : > { %2325 = vmatpush3.bf16.msra.mxu1 %v2429_v60 }
 0x756   : > { %v1747_v29 = vpop.f32.mrb[16].mxu1 }
 0x757   : > { %v1753_v16 = vadd.f32 %v1747_v29, %v2721_v1  ;;  %v2300_v30 = vpop.f32.mrb[17].mxu1  ;;  %v2421_v1 = vld [vmem:[%s2706_s26 + $0x8] sm:$0xff]  }
 0x758   : > { %v1750_v31 = vpop.f32.mrb[18].mxu1  ;;  %2305 = vmatpush3.bf16.msra.mxu0 %v2421_v1 }
 0x759   : > { %v2929_v32 = vadd.f32 %v1757_v14, %v1753_v16  ;;  %v2301_v33 = vpop.f32.mrb[19].mxu1 }
 0x75b   : > { %v1759_v34 = vsel %vm477_vm1, %v2929_v32, 0.0 }
 0x75c   : > { %1760 = vadd.xlane.f32.xlu1 %v1759_v34 }
 0x7e9   : > { %v1761_v35 = vpop.xlane.xlu1 %1760 }
 0x7ea   : > { %v1762_v36 = vmul.f32 0.03125, %v1761_v35 }
 0x7ec   : > { %v1763_v37 = vsub.f32 %v2929_v32, %v1762_v36 }
 0x7ee   : > { %v1764_v38 = vmul.f32 %v1763_v37, %v1763_v37 }
 0x7f0   : > { %v1765_v39 = vsel %vm477_vm1, %v1764_v38, 0.0 }
 0x7f1   : > { %1766 = vadd.xlane.f32.xlu0 %v1765_v39 }
 0x87e   : > { %v1767_v41 = vpop.xlane.xlu0 %1766 }
 0x87f   : > { %v1768_v42 = vmul.f32 0.03125, %v1767_v41 }
 0x881   : > { %v1769_v43 = vadd.f32 1e-05, %v1768_v42 }
 0x883   : > { %2448 = vrsqrt.f32 %v1769_v43 }
 0x88d   : > { %v2449_v48 = vpop.eup %2448 }
 0x88e   : > { %v1771_v49 = vmul.f32 %v2449_v48, %v1763_v37 }
 0x890   : > { %v1776_v51 = vmul.f32 %v1775_v47, %v1771_v49 }
 0x892   : > { %v1781_v52 = vadd.f32 %v1780_v50, %v1776_v51 }
 0x894   : > { %v1782_v53 = vpack.c.bf16 %v1781_v52, %v1781_v52 }
 0x896   : > { %2307 = vmatmul.mubr.msk.bf16.vlgmr.msra.gmra.mrb[28].mxu0 %vm477_vm1, %v1782_v53 }
 0x969   : > { %v1838_v62 = vpop.f32.mrb[28].mxu0 }
 0x96a   : > { %v1839_v0 = vadd.f32 %v2160_v61, %v1838_v62  ;;  %v2308_v2 = vpop.f32.mrb[29].mxu0 }
 0x96b   : > { %v1841_v3 = vpop.f32.mrb[30].mxu0 }
 0x96c   : > { %v1844_v6 = vmul.f32 %v1839_v0, %v1839_v0  ;;  %v2309_v44 = vpop.f32.mrb[31].mxu0 }
 0x96e   : > { %v1845_v7 = vmul.f32 %v1844_v6, %v1839_v0 }
 0x970   : > { %v1846_v8 = vmul.f32 0.044715, %v1845_v7 }
 0x972   : > { %v1847_v10 = vadd.f32 %v1846_v8, %v1839_v0 }
 0x974   : > { %v1848_v11 = vmul.f32 0.7978846, %v1847_v10 }
 0x976   : > { %2450 = vtanh.f32 %v1848_v11 }
 0x980   : > { %v2451_v12 = vpop.eup %2450 }
 0x981   : > { %v1850_v9 = vadd.f32 1.0, %v2451_v12 }
 0x983   : > { %v1851_v13 = vmul.f32 0.5, %v1850_v9 }
 0x985   : > { %v1852_v18 = vmul.f32 %v1851_v13, %v1839_v0 }
 0x987   : > { %v1853_v4 = vpack.c.bf16 %v1852_v18, %v1852_v18 }
 0x989   : > { %2327 = vmatmul.mubr.bf16.vlgmr.msra.gmra.mrb[20].mxu1 %v1853_v4 }
 0xa5b   : > { %1952 = sbr.rel (%p2173_p1) target bundleno = 2658 (0xa62), region = 60 }
 0xa5c   : > { %v1936_v19 = vpop.f32.mrb[20].mxu1 }
 0xa5d   : > { %v1942_v20 = vadd.f32 %v1936_v19, %v2929_v32  ;;  %v2328_v21 = vpop.f32.mrb[21].mxu1 }
 0xa5e   : > { %v1939_v22 = vpop.f32.mrb[22].mxu1 }
 0xa5f   : > { %v1947_v57 = vadd.f32 %v2172_v5, %v1942_v20  ;;  %v2329_v23 = vpop.f32.mrb[23].mxu1 }
 0xa61   : > { %1948 = vst.msk [vmem:[#allocation2] sm:$0xff] %vm477_vm1, %v1947_v57  ;;  %1953 = vst.msk [vmem:[%s394_s21] sm:$0xff] (!%p2173_p1), %vm477_vm1, %v1947_v57 }
 0xa62 PF: > { %s2175_s22 = sshll.u32 %s2534_s9, 7  ;;  %s3059_s15 = sld [smem:[#allocation16_spill]] }
 0xa63   : > { %s1968_s10 = sshll.u32 %s394_s21, 4  ;;  %s3060_s30 = sand.u32 1, %s2522_s28   ;;  %s1969_s10 = int_to_ptr.vmem [resolvable:$true] %s1968_s10 }
 0xa64   : > { %s1955_s11 = scalar_lea.sflag [#allocation4], %s3060_s30  ;;  %s2452_s0 = scalar_lea.vmem %s1969_s10, 128 }
 0xa65   : > { %p2453_p2 = scmp.ne.s32.totalorder %s1969_s10, %s2452_s0  ;;  %s2558_s8 = smov [#allocation3]  }
 0xa66   : > { %s2456_s27 = sshll.u32 %s2558_s8, 4  ;;  %s2457_s27 = int_to_ptr.vmem [resolvable:$false] %s2456_s27 }
 0xa67   : > { %p2454_p4 = pnand %p2453_p2, %p2653_p3  ;;  %s2458_s29 = scalar_lea.vmem %s2457_s27, 256 }
 0xa68   : > { %s2974_s16 = scalar_lea.hbm %s3059_s15, %s2175_s22  ;;  %p2459_p6 = scmp.lt.s32.totalorder %s1969_s10, %s2457_s27 }
 0xa69   : > { %p2455_p5 = pneg %p2454_p4  ;;  %p2460_p7 = scmp.lt.s32.totalorder %s2458_s29, %s2452_s0 }
 0xa6b   : > { %p2461_p8 = por %p2460_p7, %p2459_p6 }
 0xa6d   : > { %p2462_p10 = pnand %p2461_p8, %p2455_p5 }
 0xa6f   : > { %2465 = shalt.err (!%p2462_p10)
}
 0xa70   : > { %s2466_s9 = scalar_lea.hbm %s2974_s16, 128  ;;  %s2470_s18 = scalar_lea.hbm %s3059_s15, 256 }
 0xa71   : > { %p2467_p11 = scmp.ne.s32.totalorder %s2974_s16, %s2466_s9  ;;  %p2471_p0 = scmp.lt.u32.totalorder %s2974_s16, %s3059_s15 }
 0xa72   : > { %p2472_p1 = scmp.lt.u32.totalorder %s2470_s18, %s2466_s9  ;;  %p2474_p4 = scmp.lt.u32.totalorder %s2466_s9, %s2974_s16 }
 0xa73   : > { %p2468_p12 = pnand %p2467_p11, %p2653_p3 }
 0xa74   : > { %p2473_p2 = por %p2472_p1, %p2471_p0 }
 0xa75   : > { %p2469_p13 = pneg %p2468_p12 }
 0xa76   : > { %p2475_p5 = por %p2474_p4, %p2473_p2 }
 0xa78   : > { %p2476_p6 = pnand %p2475_p5, %p2469_p13 }
 0xa7a   : > { %2479 = shalt.err (!%p2476_p6)
}
 0xa7b   : > { %2331 = dma.vmem_to_hbm [thread:$0]  (%p2653_p3), %s1969_s10, 128, %s2974_s16, %s1955_s11  }
 0xa7c PF: > { %s3061_s20 = sld [smem:[#allocation10_spill]]  ;;  %s3062_s24 = sld [smem:[#allocation6_spill]] }
 0xa82   : > { %p2337_p7 = scmp.ge.s32.totalorder %s3061_s20, 2  ;;  %s1980_s13 = sand.u32 1, %s3062_s24  }
 0xa83   : > { %s1981_s22 = scalar_lea.sflag [#allocation4], %s1980_s13 }
 0xa84   : > { %p2334_p8 = pnand %p2337_p7, %p2663_p9 }
 0xa86   : > { %2513 = dma.done.wait (!%p2334_p8), %s1981_s22, 128  }
 0xa87   : > { %2515 = vsyncadd (!%p2334_p8), %s1981_s22, 4294967168  ;;  %s21_s12 = sadd.s32 1, %s3061_s20   ;;  %s3064_s25 = sld [smem:[#allocation7_spill]] }
 0xa88   : > { %p18_p10 = scmp.ge.s32.totalorder %s21_s12, 6   ;;  %s3065_s29 = sld [smem:[#allocation14_spill]] }
 0xa89   : > { %s3066_s30 = sld [smem:[#allocation8_spill]]  ;;  %s3067_s9 = sld [smem:[#allocation9_spill]] }
 0xa8a   : > { %s3068_s10 = sld [smem:[#allocation11_spill]]  ;;  %s3069_s11 = sld [smem:[#allocation12_spill]] }
 0xa8b   : > { %s3070_s27 = smov %s2522_s28  ;;  %20 = sbr.rel (!%p18_p10) target bundleno = 8 (0x8), region = 115 }
 0xa8d   : > { %s3071_s28 = smov %s3064_s25 }
 0xa92   :  { %1986 = vsyncpa [#allocation4], 1 }
 0xa93   :  { %1988 = vsyncpa [#allocation4 + $0x1], 1 }

</bundles_post_ra>
